<compile_context>
chip_gen: v5e
topology: v5e:2x2
jax: 0.10.0
libtpu: 0.0.40
codegen_flags: <defaults>
</compile_context>

<pallas_src>
import functools

import jax
import jax.numpy as jnp
from jax import lax
from jax.experimental import pallas as pl
from jax.experimental.pallas import tpu as pltpu


def attention_kernel(x_ref, wqkv_ref, wproj_ref, bproj_ref, o_ref,
                     *, num_heads, scale):
    # x_ref:     (1, N, C)  full sequence for this batch element (compute dtype)
    # wqkv_ref:  (C, 3C)    [q | k | v] columns, heads contiguous in each third
    # wproj_ref: (C, C)
    # bproj_ref: (1, C)     float32
    # o_ref:     (1, N, C)  output rows for this batch element
    _, N, C = x_ref.shape
    H = num_heads
    hd = C // H
    cdt = wqkv_ref.dtype                 # MXU compute dtype (bf16 by default)

    x2d = x_ref[0]                                               # (N, C)

    # --- fused QKV projection: one (N, C) x (C, 3C) MXU pass, f32 acc ---
    qkv = jnp.dot(x2d, wqkv_ref[...],
                  preferred_element_type=jnp.float32)            # (N, 3C)

    out = jnp.zeros((N, C), jnp.float32)
    for h in range(H):                    # static, H is small -> fully unrolled
        # per-head q/k/v: static lane slices, kept in registers (no scratch).
        q_h = (qkv[:, h * hd:(h + 1) * hd] * scale).astype(cdt)          # (N, hd)
        k_h = qkv[:, C + h * hd:C + (h + 1) * hd].astype(cdt)            # (N, hd)
        v_h = qkv[:, 2 * C + h * hd:2 * C + (h + 1) * hd].astype(cdt)    # (N, hd)

        # logits with the k-transpose absorbed into the contraction.
        s = lax.dot_general(q_h, k_h, (((1,), (1,)), ((), ())),
                            preferred_element_type=jnp.float32)  # (N, N)
        # numerically-stable softmax, all in f32 (v5e VPU/EUP have no bf16).
        s = s - jnp.max(s, axis=-1, keepdims=True)
        p = jnp.exp(s)
        denom = jnp.sum(p, axis=-1, keepdims=True)               # (N, 1)
        # TODO(synk): attn_drop with p > 0 (training mode) not implemented.
        ctx = jnp.dot(p.astype(cdt), v_h,
                      preferred_element_type=jnp.float32)        # (N, hd)
        # deferred normalization on the small context; approx recip -> EUP slot.
        ctx = ctx * pl.reciprocal(denom, approx=True)

        # head merge folded into the output projection (no concat / lane moves):
        #   out += ctx_h @ W_proj[h*hd:(h+1)*hd, :]
        out = out + jnp.dot(ctx.astype(cdt),
                            wproj_ref[h * hd:(h + 1) * hd, :],
                            preferred_element_type=jnp.float32)  # (N, C)

    out = out + bproj_ref[...].astype(jnp.float32)               # (1, C) bcast
    # TODO(synk): proj_drop with p > 0 (training mode) not implemented.
    o_ref[0] = out.astype(o_ref.dtype)


def attention_forward(x, w_qkv, w_proj, b_proj, *, num_heads, scale,
                      compute_dtype=jnp.bfloat16):
    B, N, C = x.shape
    assert C % num_heads == 0, "dim must be divisible by num_heads"
    hd = C // num_heads

    # bf16 matmul inputs (f32 accumulation + f32 softmax inside the kernel):
    # hits the bf16 MXU path and halves x/weight DMA bytes and VMEM footprint.
    xc = x.astype(compute_dtype)
    wqkv = w_qkv.astype(compute_dtype)
    wproj = w_proj.astype(compute_dtype)
    bproj = b_proj.astype(jnp.float32)

    kernel = functools.partial(attention_kernel, num_heads=num_heads, scale=scale)

    itemsize = jnp.dtype(compute_dtype).itemsize
    flops = B * (2 * N * C * 3 * C            # fused qkv projection
                 + 4 * N * N * C              # q.k^T and attn.v over all heads
                 + 2 * N * C * C)             # output projection (head-folded)
    bytes_accessed = (B * N * C * itemsize          # x
                      + 3 * C * C * itemsize        # w_qkv
                      + C * C * itemsize            # w_proj
                      + C * 4                       # bias
                      + B * N * C * x.dtype.itemsize)  # output
    cost = pl.CostEstimate(flops=flops,
                           transcendentals=B * num_heads * N * N,
                           bytes_accessed=bytes_accessed)

    return pl.pallas_call(
        kernel,
        out_shape=jax.ShapeDtypeStruct((B, N, C), x.dtype),
        grid_spec=pltpu.PrefetchScalarGridSpec(
            num_scalar_prefetch=0,
            # one grid step per batch element: at ConTransformer scale this is
            # 2 fat steps (keeps both v7x TensorCores busy while amortizing the
            # ~0.35us per-step overhead on v5e/v6e).
            grid=(B,),
            in_specs=[
                pl.BlockSpec((1, N, C), lambda b: (b, 0, 0)),
                # grid-invariant weights: DMA'd once (index_map constant).
                pl.BlockSpec((C, 3 * C), lambda b: (0, 0)),
                pl.BlockSpec((C, C), lambda b: (0, 0)),
                pl.BlockSpec((1, C), lambda b: (0, 0)),
            ],
            out_specs=pl.BlockSpec((1, N, C), lambda b: (b, 0, 0)),
        ),
        compiler_params=pltpu.CompilerParams(
            # no cross-iteration state (no scratch) -> batch axis is truly
            # independent and safe to shard across TensorCores.
            dimension_semantics=("parallel",)),
        cost_estimate=cost,
    )(xc, wqkv, wproj, bproj)


def attention_reference(x, w_qkv, w_proj, b_proj, *, num_heads, scale):
    """Plain-JAX f32 reference mirroring the PyTorch forward."""
    B, N, C = x.shape
    hd = C // num_heads
    qkv = jnp.einsum('bnc,cd->bnd', x, w_qkv)                 # (B, N, 3C)
    qkv = qkv.reshape(B, N, 3, num_heads, hd).transpose(2, 0, 3, 1, 4)
    q, k, v = qkv[0], qkv[1], qkv[2]                          # (B, H, N, hd)
    attn = jnp.einsum('bhnd,bhmd->bhnm', q, k) * scale
    attn = jax.nn.softmax(attn, axis=-1)
    out = jnp.einsum('bhnm,bhmd->bhnd', attn, v)              # (B, H, N, hd)
    out = out.transpose(0, 2, 1, 3).reshape(B, N, C)
    return jnp.einsum('bnc,cd->bnd', out, w_proj) + b_proj[0]


if __name__ == "__main__":
    # ConTransformer transformer branch: embed_dim = base_channel * patch_size
    # = 2 * 16 = 32 channels, 4 heads, short patch sequence.
    B, N, C = 2, 8, 32
    num_heads = 4
    head_dim = C // num_heads
    scale = head_dim ** (-0.5)

    key = jax.random.PRNGKey(0)
    kx, kqkv, kproj, kb = jax.random.split(key, 4)

    x = jax.random.normal(kx, (B, N, C), dtype=jnp.float32)
    # qkv: Linear(dim, 3*dim, bias=False)  -> stored as (C, 3C)
    w_qkv = jax.random.normal(kqkv, (C, 3 * C), dtype=jnp.float32) * 0.1
    # proj: Linear(dim, dim) with bias     -> stored as (C, C), bias (1, C)
    w_proj = jax.random.normal(kproj, (C, C), dtype=jnp.float32) * 0.1
    b_proj = jax.random.normal(kb, (1, C), dtype=jnp.float32) * 0.1

    out = attention_forward(x, w_qkv, w_proj, b_proj,
                            num_heads=num_heads, scale=scale)
    out = jax.block_until_ready(out)

    ref = attention_reference(x, w_qkv, w_proj, b_proj,
                              num_heads=num_heads, scale=scale)
    assert out.shape == (B, N, C)
    # bf16 matmul inputs (f32 accumulation) + approx reciprocal -> compare
    # against the f32 reference with a bf16-appropriate tolerance.
    assert jnp.allclose(out, ref, atol=5e-2, rtol=5e-2), "mismatch vs reference"

    print("KERNEL_OK")
</pallas_src>

<mosaic_0001>
module attributes {stable_mosaic.version = 11 : i64} {
  func.func @attention_kernel(%arg0: i32, %arg1: memref<1x8x32xbf16, #tpu.memory_space<vmem>>, %arg2: memref<32x96xbf16, #tpu.memory_space<vmem>>, %arg3: memref<32x32xbf16, #tpu.memory_space<vmem>>, %arg4: memref<1x32xf32, #tpu.memory_space<vmem>>, %arg5: memref<1x8x32xf32, #tpu.memory_space<vmem>>) attributes {dimension_semantics = [#tpu.dimension_semantics<parallel>], iteration_bounds = array<i64: 2>, scalar_prefetch = 0 : i64, scratch_operands = 0 : i64, tpu.core_type = #tpu.core_type<tc>, window_params = [{transform_indices = @transform_0, window_bounds = array<i64: 1, 8, 32>}, {pipeline_mode = #tpu.pipeline_mode<synchronous>, transform_indices = @transform_1, window_bounds = array<i64: 32, 96>}, {pipeline_mode = #tpu.pipeline_mode<synchronous>, transform_indices = @transform_2, window_bounds = array<i64: 32, 32>}, {pipeline_mode = #tpu.pipeline_mode<synchronous>, transform_indices = @transform_3, window_bounds = array<i64: 1, 32>}, {transform_indices = @transform_4, window_bounds = array<i64: 1, 8, 32>}]} {
    %c0 = arith.constant 0 : index
    %c0_0 = arith.constant 0 : index
    %c0_1 = arith.constant 0 : index
    %0 = vector.load %arg1[%c0, %c0_0, %c0_1] : memref<1x8x32xbf16, #tpu.memory_space<vmem>>, vector<1x8x32xbf16>
    %1 = vector.shape_cast %0 : vector<1x8x32xbf16> to vector<8x32xbf16>
    %c0_2 = arith.constant 0 : index
    %c0_3 = arith.constant 0 : index
    %2 = vector.load %arg2[%c0_2, %c0_3] : memref<32x96xbf16, #tpu.memory_space<vmem>>, vector<32x96xbf16>
    %cst = arith.constant dense<0.000000e+00> : vector<8x96xf32>
    %3 = tpu.matmul %1, %2, %cst {dimension_numbers = #tpu.dot_dimension_numbers<[1], [0], [0], [1], [0, 0, 1, 1], [], []>} : vector<8x32xbf16>, vector<32x96xbf16>, vector<8x96xf32> -> vector<8x96xf32>
    %cst_4 = arith.constant 0.000000e+00 : f32
    %4 = vector.broadcast %cst_4 : f32 to vector<8x32xf32>
    %5 = vector.extract_strided_slice %3 {offsets = [0, 0], sizes = [8, 8], strides = [1, 1]} : vector<8x96xf32> to vector<8x8xf32>
    %cst_5 = arith.constant 0.353553385 : f32
    %6 = vector.broadcast %cst_5 : f32 to vector<8x8xf32>
    %7 = arith.mulf %5, %6 : vector<8x8xf32>
    %8 = arith.truncf %7 : vector<8x8xf32> to vector<8x8xbf16>
    %9 = vector.extract_strided_slice %3 {offsets = [0, 32], sizes = [8, 8], strides = [1, 1]} : vector<8x96xf32> to vector<8x8xf32>
    %10 = arith.truncf %9 : vector<8x8xf32> to vector<8x8xbf16>
    %11 = vector.extract_strided_slice %3 {offsets = [0, 64], sizes = [8, 8], strides = [1, 1]} : vector<8x96xf32> to vector<8x8xf32>
    %12 = arith.truncf %11 : vector<8x8xf32> to vector<8x8xbf16>
    %cst_6 = arith.constant dense<0.000000e+00> : vector<8x8xf32>
    %13 = tpu.matmul %8, %10, %cst_6 {dimension_numbers = #tpu.dot_dimension_numbers<[1], [1], [0], [0], [0, 0, 1, 0], [], []>} : vector<8x8xbf16>, vector<8x8xbf16>, vector<8x8xf32> -> vector<8x8xf32>
    %cst_7 = arith.constant dense<0xFF800000> : vector<8xf32>
    %14 = vector.multi_reduction <maximumf>, %13, %cst_7 [1] : vector<8x8xf32> to vector<8xf32>
    %15 = vector.shape_cast %14 : vector<8xf32> to vector<8x1xf32>
    %16 = vector.broadcast %15 : vector<8x1xf32> to vector<8x8xf32>
    %17 = arith.subf %13, %16 : vector<8x8xf32>
    %18 = math.exp %17 : vector<8x8xf32>
    %cst_8 = arith.constant dense<0.000000e+00> : vector<8xf32>
    %19 = vector.multi_reduction <add>, %18, %cst_8 [1] : vector<8x8xf32> to vector<8xf32>
    %20 = vector.shape_cast %19 : vector<8xf32> to vector<8x1xf32>
    %21 = arith.truncf %18 : vector<8x8xf32> to vector<8x8xbf16>
    %cst_9 = arith.constant dense<0.000000e+00> : vector<8x8xf32>
    %22 = tpu.matmul %21, %12, %cst_9 {dimension_numbers = #tpu.dot_dimension_numbers<[1], [0], [0], [1], [0, 0, 1, 1], [], []>} : vector<8x8xbf16>, vector<8x8xbf16>, vector<8x8xf32> -> vector<8x8xf32>
    %23 = tpu.reciprocal %20 {approx = true} : vector<8x1xf32> -> vector<8x1xf32>
    %24 = vector.broadcast %23 : vector<8x1xf32> to vector<8x8xf32>
    %25 = arith.mulf %22, %24 : vector<8x8xf32>
    %26 = arith.truncf %25 : vector<8x8xf32> to vector<8x8xbf16>
    %c0_10 = arith.constant 0 : index
    %c0_11 = arith.constant 0 : index
    %27 = vector.load %arg3[%c0_10, %c0_11] : memref<32x32xbf16, #tpu.memory_space<vmem>>, vector<8x32xbf16>
    %cst_12 = arith.constant dense<0.000000e+00> : vector<8x32xf32>
    %28 = tpu.matmul %26, %27, %cst_12 {dimension_numbers = #tpu.dot_dimension_numbers<[1], [0], [0], [1], [0, 0, 1, 1], [], []>} : vector<8x8xbf16>, vector<8x32xbf16>, vector<8x32xf32> -> vector<8x32xf32>
    %29 = arith.addf %4, %28 : vector<8x32xf32>
    %30 = vector.extract_strided_slice %3 {offsets = [0, 8], sizes = [8, 8], strides = [1, 1]} : vector<8x96xf32> to vector<8x8xf32>
    %cst_13 = arith.constant 0.353553385 : f32
    %31 = vector.broadcast %cst_13 : f32 to vector<8x8xf32>
    %32 = arith.mulf %30, %31 : vector<8x8xf32>
    %33 = arith.truncf %32 : vector<8x8xf32> to vector<8x8xbf16>
    %34 = vector.extract_strided_slice %3 {offsets = [0, 40], sizes = [8, 8], strides = [1, 1]} : vector<8x96xf32> to vector<8x8xf32>
    %35 = arith.truncf %34 : vector<8x8xf32> to vector<8x8xbf16>
    %36 = vector.extract_strided_slice %3 {offsets = [0, 72], sizes = [8, 8], strides = [1, 1]} : vector<8x96xf32> to vector<8x8xf32>
    %37 = arith.truncf %36 : vector<8x8xf32> to vector<8x8xbf16>
    %cst_14 = arith.constant dense<0.000000e+00> : vector<8x8xf32>
    %38 = tpu.matmul %33, %35, %cst_14 {dimension_numbers = #tpu.dot_dimension_numbers<[1], [1], [0], [0], [0, 0, 1, 0], [], []>} : vector<8x8xbf16>, vector<8x8xbf16>, vector<8x8xf32> -> vector<8x8xf32>
    %cst_15 = arith.constant dense<0xFF800000> : vector<8xf32>
    %39 = vector.multi_reduction <maximumf>, %38, %cst_15 [1] : vector<8x8xf32> to vector<8xf32>
    %40 = vector.shape_cast %39 : vector<8xf32> to vector<8x1xf32>
    %41 = vector.broadcast %40 : vector<8x1xf32> to vector<8x8xf32>
    %42 = arith.subf %38, %41 : vector<8x8xf32>
    %43 = math.exp %42 : vector<8x8xf32>
    %cst_16 = arith.constant dense<0.000000e+00> : vector<8xf32>
    %44 = vector.multi_reduction <add>, %43, %cst_16 [1] : vector<8x8xf32> to vector<8xf32>
    %45 = vector.shape_cast %44 : vector<8xf32> to vector<8x1xf32>
    %46 = arith.truncf %43 : vector<8x8xf32> to vector<8x8xbf16>
    %cst_17 = arith.constant dense<0.000000e+00> : vector<8x8xf32>
    %47 = tpu.matmul %46, %37, %cst_17 {dimension_numbers = #tpu.dot_dimension_numbers<[1], [0], [0], [1], [0, 0, 1, 1], [], []>} : vector<8x8xbf16>, vector<8x8xbf16>, vector<8x8xf32> -> vector<8x8xf32>
    %48 = tpu.reciprocal %45 {approx = true} : vector<8x1xf32> -> vector<8x1xf32>
    %49 = vector.broadcast %48 : vector<8x1xf32> to vector<8x8xf32>
    %50 = arith.mulf %47, %49 : vector<8x8xf32>
    %51 = arith.truncf %50 : vector<8x8xf32> to vector<8x8xbf16>
    %c8 = arith.constant 8 : index
    %c0_18 = arith.constant 0 : index
    %52 = vector.load %arg3[%c8, %c0_18] : memref<32x32xbf16, #tpu.memory_space<vmem>>, vector<8x32xbf16>
    %cst_19 = arith.constant dense<0.000000e+00> : vector<8x32xf32>
    %53 = tpu.matmul %51, %52, %cst_19 {dimension_numbers = #tpu.dot_dimension_numbers<[1], [0], [0], [1], [0, 0, 1, 1], [], []>} : vector<8x8xbf16>, vector<8x32xbf16>, vector<8x32xf32> -> vector<8x32xf32>
    %54 = arith.addf %29, %53 : vector<8x32xf32>
    %55 = vector.extract_strided_slice %3 {offsets = [0, 16], sizes = [8, 8], strides = [1, 1]} : vector<8x96xf32> to vector<8x8xf32>
    %cst_20 = arith.constant 0.353553385 : f32
    %56 = vector.broadcast %cst_20 : f32 to vector<8x8xf32>
    %57 = arith.mulf %55, %56 : vector<8x8xf32>
    %58 = arith.truncf %57 : vector<8x8xf32> to vector<8x8xbf16>
    %59 = vector.extract_strided_slice %3 {offsets = [0, 48], sizes = [8, 8], strides = [1, 1]} : vector<8x96xf32> to vector<8x8xf32>
    %60 = arith.truncf %59 : vector<8x8xf32> to vector<8x8xbf16>
    %61 = vector.extract_strided_slice %3 {offsets = [0, 80], sizes = [8, 8], strides = [1, 1]} : vector<8x96xf32> to vector<8x8xf32>
    %62 = arith.truncf %61 : vector<8x8xf32> to vector<8x8xbf16>
    %cst_21 = arith.constant dense<0.000000e+00> : vector<8x8xf32>
    %63 = tpu.matmul %58, %60, %cst_21 {dimension_numbers = #tpu.dot_dimension_numbers<[1], [1], [0], [0], [0, 0, 1, 0], [], []>} : vector<8x8xbf16>, vector<8x8xbf16>, vector<8x8xf32> -> vector<8x8xf32>
    %cst_22 = arith.constant dense<0xFF800000> : vector<8xf32>
    %64 = vector.multi_reduction <maximumf>, %63, %cst_22 [1] : vector<8x8xf32> to vector<8xf32>
    %65 = vector.shape_cast %64 : vector<8xf32> to vector<8x1xf32>
    %66 = vector.broadcast %65 : vector<8x1xf32> to vector<8x8xf32>
    %67 = arith.subf %63, %66 : vector<8x8xf32>
    %68 = math.exp %67 : vector<8x8xf32>
    %cst_23 = arith.constant dense<0.000000e+00> : vector<8xf32>
    %69 = vector.multi_reduction <add>, %68, %cst_23 [1] : vector<8x8xf32> to vector<8xf32>
    %70 = vector.shape_cast %69 : vector<8xf32> to vector<8x1xf32>
    %71 = arith.truncf %68 : vector<8x8xf32> to vector<8x8xbf16>
    %cst_24 = arith.constant dense<0.000000e+00> : vector<8x8xf32>
    %72 = tpu.matmul %71, %62, %cst_24 {dimension_numbers = #tpu.dot_dimension_numbers<[1], [0], [0], [1], [0, 0, 1, 1], [], []>} : vector<8x8xbf16>, vector<8x8xbf16>, vector<8x8xf32> -> vector<8x8xf32>
    %73 = tpu.reciprocal %70 {approx = true} : vector<8x1xf32> -> vector<8x1xf32>
    %74 = vector.broadcast %73 : vector<8x1xf32> to vector<8x8xf32>
    %75 = arith.mulf %72, %74 : vector<8x8xf32>
    %76 = arith.truncf %75 : vector<8x8xf32> to vector<8x8xbf16>
    %c16 = arith.constant 16 : index
    %c0_25 = arith.constant 0 : index
    %77 = vector.load %arg3[%c16, %c0_25] : memref<32x32xbf16, #tpu.memory_space<vmem>>, vector<8x32xbf16>
    %cst_26 = arith.constant dense<0.000000e+00> : vector<8x32xf32>
    %78 = tpu.matmul %76, %77, %cst_26 {dimension_numbers = #tpu.dot_dimension_numbers<[1], [0], [0], [1], [0, 0, 1, 1], [], []>} : vector<8x8xbf16>, vector<8x32xbf16>, vector<8x32xf32> -> vector<8x32xf32>
    %79 = arith.addf %54, %78 : vector<8x32xf32>
    %80 = vector.extract_strided_slice %3 {offsets = [0, 24], sizes = [8, 8], strides = [1, 1]} : vector<8x96xf32> to vector<8x8xf32>
    %cst_27 = arith.constant 0.353553385 : f32
    %81 = vector.broadcast %cst_27 : f32 to vector<8x8xf32>
    %82 = arith.mulf %80, %81 : vector<8x8xf32>
    %83 = arith.truncf %82 : vector<8x8xf32> to vector<8x8xbf16>
    %84 = vector.extract_strided_slice %3 {offsets = [0, 56], sizes = [8, 8], strides = [1, 1]} : vector<8x96xf32> to vector<8x8xf32>
    %85 = arith.truncf %84 : vector<8x8xf32> to vector<8x8xbf16>
    %86 = vector.extract_strided_slice %3 {offsets = [0, 88], sizes = [8, 8], strides = [1, 1]} : vector<8x96xf32> to vector<8x8xf32>
    %87 = arith.truncf %86 : vector<8x8xf32> to vector<8x8xbf16>
    %cst_28 = arith.constant dense<0.000000e+00> : vector<8x8xf32>
    %88 = tpu.matmul %83, %85, %cst_28 {dimension_numbers = #tpu.dot_dimension_numbers<[1], [1], [0], [0], [0, 0, 1, 0], [], []>} : vector<8x8xbf16>, vector<8x8xbf16>, vector<8x8xf32> -> vector<8x8xf32>
    %cst_29 = arith.constant dense<0xFF800000> : vector<8xf32>
    %89 = vector.multi_reduction <maximumf>, %88, %cst_29 [1] : vector<8x8xf32> to vector<8xf32>
    %90 = vector.shape_cast %89 : vector<8xf32> to vector<8x1xf32>
    %91 = vector.broadcast %90 : vector<8x1xf32> to vector<8x8xf32>
    %92 = arith.subf %88, %91 : vector<8x8xf32>
    %93 = math.exp %92 : vector<8x8xf32>
    %cst_30 = arith.constant dense<0.000000e+00> : vector<8xf32>
    %94 = vector.multi_reduction <add>, %93, %cst_30 [1] : vector<8x8xf32> to vector<8xf32>
    %95 = vector.shape_cast %94 : vector<8xf32> to vector<8x1xf32>
    %96 = arith.truncf %93 : vector<8x8xf32> to vector<8x8xbf16>
    %cst_31 = arith.constant dense<0.000000e+00> : vector<8x8xf32>
    %97 = tpu.matmul %96, %87, %cst_31 {dimension_numbers = #tpu.dot_dimension_numbers<[1], [0], [0], [1], [0, 0, 1, 1], [], []>} : vector<8x8xbf16>, vector<8x8xbf16>, vector<8x8xf32> -> vector<8x8xf32>
    %98 = tpu.reciprocal %95 {approx = true} : vector<8x1xf32> -> vector<8x1xf32>
    %99 = vector.broadcast %98 : vector<8x1xf32> to vector<8x8xf32>
    %100 = arith.mulf %97, %99 : vector<8x8xf32>
    %101 = arith.truncf %100 : vector<8x8xf32> to vector<8x8xbf16>
    %c24 = arith.constant 24 : index
    %c0_32 = arith.constant 0 : index
    %102 = vector.load %arg3[%c24, %c0_32] : memref<32x32xbf16, #tpu.memory_space<vmem>>, vector<8x32xbf16>
    %cst_33 = arith.constant dense<0.000000e+00> : vector<8x32xf32>
    %103 = tpu.matmul %101, %102, %cst_33 {dimension_numbers = #tpu.dot_dimension_numbers<[1], [0], [0], [1], [0, 0, 1, 1], [], []>} : vector<8x8xbf16>, vector<8x32xbf16>, vector<8x32xf32> -> vector<8x32xf32>
    %104 = arith.addf %79, %103 : vector<8x32xf32>
    %c0_34 = arith.constant 0 : index
    %c0_35 = arith.constant 0 : index
    %105 = vector.load %arg4[%c0_34, %c0_35] : memref<1x32xf32, #tpu.memory_space<vmem>>, vector<1x32xf32>
    %106 = vector.broadcast %105 : vector<1x32xf32> to vector<8x32xf32>
    %107 = arith.addf %104, %106 : vector<8x32xf32>
    %c0_36 = arith.constant 0 : index
    %c0_37 = arith.constant 0 : index
    %c0_38 = arith.constant 0 : index
    %108 = vector.load %arg5[%c0_36, %c0_37, %c0_38] : memref<1x8x32xf32, #tpu.memory_space<vmem>>, vector<1x8x32xf32>
    %109 = vector.shape_cast %108 : vector<1x8x32xf32> to vector<8x32xf32>
    %110 = vector.shape_cast %107 : vector<8x32xf32> to vector<1x8x32xf32>
    tpu.vector_store %arg5[%c0_36, %c0_37, %c0_38], %110 {strides = array<i32>} : memref<1x8x32xf32, #tpu.memory_space<vmem>>, vector<1x8x32xf32>,
    return
  }
  func.func @transform_0(%arg0: i32) -> (i32, i32, i32) {
    %c0_i32 = arith.constant 0 : i32
    %c0_i32_0 = arith.constant 0 : i32
    %c0_i32_1 = arith.constant 0 : i32
    return %arg0, %c0_i32, %c0_i32_0 : i32, i32, i32
  }
  func.func @transform_1(%arg0: i32) -> (i32, i32) {
    %c0_i32 = arith.constant 0 : i32
    %c0_i32_0 = arith.constant 0 : i32
    %c0_i32_1 = arith.constant 0 : i32
    return %c0_i32, %c0_i32_0 : i32, i32
  }
  func.func @transform_2(%arg0: i32) -> (i32, i32) {
    %c0_i32 = arith.constant 0 : i32
    %c0_i32_0 = arith.constant 0 : i32
    %c0_i32_1 = arith.constant 0 : i32
    return %c0_i32, %c0_i32_0 : i32, i32
  }
  func.func @transform_3(%arg0: i32) -> (i32, i32) {
    %c0_i32 = arith.constant 0 : i32
    %c0_i32_0 = arith.constant 0 : i32
    %c0_i32_1 = arith.constant 0 : i32
    return %c0_i32, %c0_i32_0 : i32, i32
  }
  func.func @transform_4(%arg0: i32) -> (i32, i32, i32) {
    %c0_i32 = arith.constant 0 : i32
    %c0_i32_0 = arith.constant 0 : i32
    %c0_i32_1 = arith.constant 0 : i32
    return %arg0, %c0_i32, %c0_i32_0 : i32, i32, i32
  }
}

</mosaic_0001>

<bundles_post_ra>
// kernel: tpu_custom_call.1
= control target key start
LH: loop header
LB: loop body
LE: loop exit
PB: predicated region body
PF: predicated region fallthrough
CT: control target
= control target key end

     0   :  { %9 = vsyncpa [#allocation3], 0  ;;  %s1240_s0 = inlined_call_operand.hbm [shape: bf16[2,8,32], index: 0, kind: input, shape index: {}]   ;;  %s1241_s1 = inlined_call_operand.hbm [shape: bf16[32,96], index: 1, kind: input, shape index: {}]   ;;  %s1242_s2 = inlined_call_operand.hbm [shape: bf16[32,32], index: 2, kind: input, shape index: {}]   ;;  %s1243_s3 = inlined_call_operand.vmem [shape: f32[1,32], index: 3, kind: input, shape index: {}]   ;;  %s1244_s4 = inlined_call_operand.hbm [shape: f32[2,8,32], index: 4, kind: output, shape index: {}]  }
   0x1   :  { %11 = vsyncpa [#allocation3 + $0x1], 0 }
   0x2   :  { %12 = vsyncpa [#allocation6], 0 }
   0x3   :  { %13 = vsyncpa [#allocation4], 0 }
   0x4   :  { %15 = vsyncpa [#allocation4 + $0x1], 0  ;;  %s1047_s15 = smov 0   ;;  %s1049_s16 = smov 0  }
   0x5   :  { %s1051_s17 = smov 0   ;;  %s1053_s18 = smov 0  }
   0x6 LB: > { %s152_s21 = sshll.u32 %s1241_s1, 4  ;;  %s1071_s22 = sadd.s32 4294967295, %s1005_s18   ;;  %s1005_s18 = sphi %s1053_s18, %s1255_s18   ;;  %s1001_s17 = sphi %s1051_s17, %s1254_s17   ;;  %s997_s16 = sphi %s1049_s16, %s1253_s16   ;;  %s993_s15 = sphi %s1047_s15, %s1252_s15   ;;  %s153_s21 = int_to_ptr.hbm [resolvable:$true] %s152_s21 }
   0x7   : > { %p710_p0 = scmp.ge.s32.totalorder %s1005_s18, 1  ;;  %p42_p1 = scmp.eq.s32.totalorder %s1071_s22, 0 }
   0x8   : > { %p141_p2 = scmp.lt.s32.totalorder %s1005_s18, 3  ;;  %s1007_s24 = smov [#allocation5]  }
   0x9   : > { %s154_s25 = sshll.u32 %s1007_s24, 4  ;;  %s166_s28 = sshll.u32 %s1242_s2, 4  ;;  %s155_s25 = int_to_ptr.vmem [resolvable:$true] %s154_s25  ;;  %s167_s28 = int_to_ptr.hbm [resolvable:$true] %s166_s28 }
   0xa   : > { %p1076_p3 = pnand %p710_p0, %p141_p2  ;;  %s1008_s29 = smov [#allocation7]  }
   0xb   : > { %s168_s30 = sshll.u32 %s1008_s29, 4  ;;  %s1009_s5 = smov 64   ;;  %s169_s30 = int_to_ptr.vmem [resolvable:$true] %s168_s30 }
   0xc   : > { %p760_p4 = pneg %p1076_p3  ;;  %s1010_s6 = smov 4  }
   0xd   : > { %s709_s7 = sadd.s32 4294967294, %s1005_s18   ;;  %s1090_s8 = sadd.s32 1, %s1005_s18  }
   0xe   : > { %p761_p6 = pnand %p760_p4, %p42_p1  ;;  %s25_s9 = ssub.s32 %s1005_s18, %s1090_s8 }
   0xf   : > { %s28_s10 = sadd.s32 1, %s1001_s17  ;;  %p26_p7 = scmp.eq.s32.totalorder %s25_s9, 0 }
  0x10   : > { %763 = dma.hbm_to_vmem [thread:$0]  (!%p761_p6), %s153_s21, 256, %s155_s25, [#allocation6], %s1009_s5, %s1009_s5, %s1010_s6  }
  0x11   : > { %766 = dma.hbm_to_vmem [thread:$0]  (!%p761_p6), %s167_s28, 256, %s169_s30, [#allocation6], %s1009_s5, %s1009_s5, %s1010_s6  }
  0x12   : > { %p35_p8 = scmp.ne.s32.totalorder %s1001_s17, %s997_s16  ;;  %p36_p9 = scmp.eq.s32.totalorder %s1005_s18, 0 }
  0x13   : > { %p41_p10 = scmp.ne.s32.totalorder %s997_s16, %s993_s15  ;;  %p128_p13 = scmp.eq.s32.totalorder %s1071_s22, 1 }
  0x14   : > { %s1101_s11 = scalar_select %p26_p7, %s1001_s17, %s28_s10  }
  0x15   : > { %p1103_p11 = por %p36_p9, %p35_p8  ;;  %p1109_p12 = por %p42_p1, %p41_p10 }
  0x16   : > { %p134_p0 = scmp.eq.s32.totalorder %s709_s7, 1  ;;  %p777_p2 = scmp.lt.s32.totalorder %s1005_s18, 2 }
  0x17   : > { %s185_s14 = sand.u32 1, %s1001_s17   ;;  %p1116_p4 = por %p128_p13, %p35_p8 }
  0x18   : > { %p1120_p6 = por %p134_p0, %p41_p10  ;;  %s714_s21 = sshll.u32 %s185_s14, 2 }
  0x19   : > { %s715_s24 = sshll.u32 %s1005_s18, 2  ;;  %s189_s28 = scalar_lea.vmem [#allocation2], %s714_s21 }
  0x1a   : > { %s193_s27 = scalar_lea.hbm %s1240_s0, %s715_s24  ;;  %s197_s29 = sshll.u32 %s189_s28, 4  ;;  %s198_s29 = int_to_ptr.vmem [resolvable:$true] %s197_s29 }
  0x1b   : > { %s195_s30 = sshll.u32 %s193_s27, 4  ;;  %p1130_p7 = pnand %p777_p2, %p1103_p11  ;;  %s196_s30 = int_to_ptr.hbm [resolvable:$true] %s195_s30 }
  0x1c   : > { %s186_s6 = scalar_lea.sflag [#allocation3], %s185_s14  ;;  %s905_s7 = sshra.s32 %s196_s30, 4  ;;  %s906_s7 = int_to_ptr.hbm [resolvable:$true] %s905_s7 }
  0x1d   : > { %s907_s9 = scalar_lea.hbm %s906_s7, 4  ;;  %p909_p9 = pneg %p1130_p7 }
  0x1e   : > { %p908_p8 = scmp.ne.s32.totalorder %s906_s7, %s907_s9  ;;  %s912_s24 = scalar_lea.hbm %s1240_s0, 8 }
  0x1f   : > { %p913_p11 = scmp.lt.s32.totalorder %s906_s7, %s1240_s0  ;;  %p914_p0 = scmp.lt.s32.totalorder %s912_s24, %s907_s9 }
  0x20   : > { %p910_p10 = pnand %p909_p9, %p908_p8 }
  0x21   : > { %p915_p2 = por %p914_p0, %p913_p11 }
  0x22   : > { %p911_p13 = pneg %p910_p10 }
  0x24   : > { %p916_p5 = pnand %p915_p2, %p911_p13 }
  0x26   : > { %919 = shalt.err (!%p916_p5)
}
  0x27   : > { %770 = dma.hbm_to_vmem [thread:$0]  (!%p1130_p7), %s196_s30, 64, %s198_s29, %s186_s6  }
  0x28   : > { %206 = sbr.rel (%p1076_p3) target bundleno = 1263 (0x4ef), region = 36  ;;  %s1147_s14 = sand.u32 (!%p1076_p3), 1, %s997_s16  }
  0x29   : > { %s717_s26 = sshll.u32 (!%p1076_p3), %s1147_s14, 2  ;;  %s209_s27 = scalar_lea.sflag (!%p1076_p3), [#allocation3], %s1147_s14 }
  0x2a   : > { %s212_s28 = scalar_lea.vmem (!%p1076_p3), [#allocation2], %s717_s26 }
  0x2d   : > { %980 = dma.done.wait (%p1109_p12), %s209_s27, 64  }
  0x2e   : > { %982 = vsyncadd (%p1109_p12), %s209_s27, 4294967232 }
  0x2f   : > { %984 = dma.done.wait (%p42_p1), [#allocation6], 512  }
  0x30   : > { %986 = vsyncadd (%p42_p1), [#allocation6], 4294966784  ;;  %v747_v0 = vld [vmem:[#allocation5 + $0x8] sm:$0xff]  ;;  %v746_v1 = vld [vmem:[#allocation5] sm:$0xff]  ;;  %vm266_vm0 = vcmask 261120   ;;  %s1011_s23 = smov 88  }
  0x31   : > { %276 = vmatpush.bf16.msra.mxu0 %v747_v0  ;;  %v249_v2 = vld [vmem:[%s212_s28] sm:$0xf]  ;;  %s1012_s13 = smov 64   ;;  %s1013_s29 = smov 96   ;;  %vm289_vm1 = vcmask 64512   ;;  %vm324_vm2 = vcmask 1043456  }
  0x32   : > { %s1014_s30 = smov 120   ;;  %s1015_s5 = smov 80   ;;  %v344_v13 = vld [vmem:[#allocation7] sm:$0xf]  ;;  %v403_v49 = vld [vmem:[#allocation7 + $0x4] sm:$0xf] }
  0x33   : > { %s1016_s6 = smov 72   ;;  %s1017_s7 = smov 112   ;;  %v427_v18 = vsel %vm324_vm2, %v344_v13, 0  ;;  %v408_v50 = vsel %vm324_vm2, %v403_v49, 0 }
  0x34   : > { %s1018_s9 = smov 104   ;;  %s1019_s10 = smov 56  }
  0x35   : > { %277 = vmatpush.bf16.msra.mxu0 %v746_v1  ;;  %s1020_s21 = smov 48   ;;  %s1021_s24 = smov 40  }
  0x36   : > { %s720_s25 = sshll.u32 %s1147_s14, 3  ;;  %s743_s12 = sshll.u32 %s1071_s22, 3 }
  0x37   : > { %s615_s28 = scalar_lea.hbm %s1244_s4, %s743_s12  ;;  %s605_s22 = scalar_lea.sflag [#allocation4], %s1147_s14 }
  0x38   : > { %729 = vmatmul.msk.bf16.vlgmr.msra.gmra.mxu0 %vm266_vm0, %v249_v2 }
  0x39   : > { %417 = vmatpush.bf16.msrb.mxu0 %v408_v50 }
  0xb5   : > { %v279_v3 = vpop.f32.mrf.mxu0 }
  0xb6   : > { %v1160_v4 = vpack.c.bf16 %v279_v3, %v279_v3  ;;  %v283_v5 = vmul.f32 0.35355338, %v279_v3 }
  0xb8   : > { %348 = vrot.lane.b32.xlu2 %v1160_v4, %s1011_s23  ;;  %319 = vrot.lane.b32.xlu1 %v1160_v4, %s1012_s13  ;;  %v284_v7 = vpack.c.bf16 %v283_v5, %v283_v5 }
  0xb9   : > { %287 = vrot.lane.b32.xlu0 %v1160_v4, %s1013_s29  ;;  %s247_s29 = scalar_lea.vmem [#allocation8], %s720_s25 }
  0xbd   : > { %v281_v6 = vpop.f32.mrf.mxu0 }
  0xc0   : > { %346 = vrot.lane.b32.xlu2 %v284_v7, %s1014_s30  ;;  %s617_s30 = sshll.u32 %s247_s29, 4  ;;  %s618_s30 = int_to_ptr.vmem [resolvable:$true] %s617_s30 }
  0xc8   : > { %444 = vrot.lane.b32.xlu2 %v1160_v4, %s1015_s5  ;;  %s619_s5 = sshll.u32 %s615_s28, 4  ;;  %s620_s5 = int_to_ptr.hbm [resolvable:$true] %s619_s5 }
  0xd0   : > { %522 = vrot.lane.b32.xlu2 %v1160_v4, %s1016_s6  ;;  %s949_s6 = sshra.s32 %s620_s5, 4  ;;  %s950_s6 = int_to_ptr.hbm [resolvable:$true] %s949_s6 }
  0xd1   : > { %p956_p12 = scmp.lt.s32.totalorder %s950_s6, %s1244_s4 }
  0xd8   : > { %442 = vrot.lane.b32.xlu2 %v284_v7, %s1017_s7  ;;  %s951_s7 = scalar_lea.hbm %s950_s6, 8 }
  0xd9   : > { %p952_p1 = scmp.ne.s32.totalorder %s950_s6, %s951_s7 }
  0xdb   : > { %p953_p3 = pnand %p952_p1, %p1116_p4 }
  0xdd   : > { %p954_p5 = pneg %p953_p3 }
  0xe0   : > { %520 = vrot.lane.b32.xlu2 %v284_v7, %s1018_s9 }
 0x112   : > { %v349_v8 = vpop.permute.xlu2 %348 }
 0x113   : > { %v354_v9 = vsel %vm289_vm1, %v349_v8, 0 }
 0x114   : > { %363 = vmatpush.bf16.xpose.msra.mxu3 %v354_v9 }
 0x11a   : > { %v347_v10 = vpop.permute.xlu2 %346 }
 0x11b   : > { %732 = vmatmul.msk.bf16.vlgmr.msra.gmra.mxu3 %vm289_vm1, %v347_v10 }
 0x122   : > { %v445_v11 = vpop.permute.xlu2 %444 }
 0x123   : > { %v450_v12 = vsel %vm289_vm1, %v445_v11, 0 }
 0x124   : > { %459 = vmatpush.bf16.xpose.msrb.mxu3 %v450_v12 }
 0x12a   : > { %v320_v14 = vpop.permute.xlu1 %319  ;;  %v523_v15 = vpop.permute.xlu2 %522 }
 0x12b   : > { %v288_v16 = vpop.permute.xlu0 %287  ;;  %v326_v17 = vsel %vm324_vm2, %v320_v14, 0  ;;  %v528_v21 = vsel %vm289_vm1, %v523_v15, 0 }
 0x12c   : > { %v294_v19 = vsel %vm289_vm1, %v288_v16, 0  ;;  %335 = vmatpush.bf16.msra.mxu2 %v326_v17 }
 0x12d   : > { %303 = vmatpush.bf16.xpose.msra.mxu1 %v294_v19 }
 0x132   : > { %v443_v20 = vpop.permute.xlu2 %442 }
 0x133   : > { %736 = vmatmul.msk.bf16.vlgmr.msrb.gmra.mxu3 %vm289_vm1, %v443_v20 }
 0x134   : > { %730 = vmatmul.msk.bf16.vlgmr.msra.gmra.mxu1 %vm289_vm1, %v284_v7 }
 0x135   : > { %436 = vmatpush.bf16.msrb.mxu1 %v427_v18 }
 0x139   : > { %537 = vmatpush.bf16.xpose.msra.mxu1 %v528_v21 }
 0x13a   : > { %v521_v30 = vpop.permute.xlu2 %520 }
 0x19e   : > { %v365_v22 = vpop.f32.mrf.mxu3 }
 0x19f   : > { %v369_v23 = vsel %vm289_vm1, %v365_v22, -inf }
 0x1a0   : > { %370 = vmax.xlane.f32.xlu2 %v369_v23  ;;  %v499_v23 = vld [vmem:[#allocation7 + $0x8] sm:$0xf] }
 0x1a6   : > { %v367_v24 = vpop.f32.mrf.mxu3 }
 0x1b1   : > { %v305_v25 = vpop.f32.mrf.mxu1 }
 0x1b2   : > { %v309_v26 = vsel %vm289_vm1, %v305_v25, -inf }
 0x1b3   : > { %310 = vmax.xlane.f32.xlu0 %v309_v26 }
 0x1b6   : > { %v461_v27 = vpop.f32.mrf.mxu3 }
 0x1b7   : > { %v465_v43 = vsel %vm289_vm1, %v461_v27, -inf }
 0x1b9   : > { %v307_v28 = vpop.f32.mrf.mxu1 }
 0x1ba   : > { %v577_v28 = vld [vmem:[#allocation7 + $0xc] sm:$0xf] }
 0x1be   : > { %v463_v29 = vpop.f32.mrf.mxu3 }
 0x1bf   : > { %v582_v29 = vsel %vm324_vm2, %v577_v28, 0 }
 0x1c7   : > { %379 = vrot.lane.b32.xlu0 %v1160_v4, %s1019_s10 }
 0x1cf   : > { %475 = vrot.lane.b32.xlu0 %v1160_v4, %s1020_s21  ;;  %s955_s21 = scalar_lea.hbm %s1244_s4, 16 }
 0x1d0   : > { %p957_p7 = scmp.lt.s32.totalorder %s955_s21, %s951_s7 }
 0x1d2   : > { %p958_p8 = por %p957_p7, %p956_p12 }
 0x1d4   : > { %p959_p9 = pnand %p958_p8, %p954_p5 }
 0x213   : > { %v371_v31 = vpop.xlane.xlu2 %370 }
 0x214   : > { %v372_v32 = vsub.f32 %v365_v22, %v371_v31 }
 0x216   : > { %v373_v33 = vmul.f32 1.442695, %v372_v32 }
 0x218   : > { %829 = vpow2.f32 %v373_v33 }
 0x21e   : > { %v830_v34 = vpop.eup %829 }
 0x21f   : > { %v375_v35 = vsel %vm289_vm1, %v830_v34, 0.0  ;;  %v378_v47 = vpack.c.bf16 %v830_v34, %v830_v34 }
 0x220   : > { %376 = vadd.xlane.f32.xlu0 %v375_v35 }
 0x226   : > { %v311_v36 = vpop.xlane.xlu0 %310 }
 0x227   : > { %v312_v37 = vsub.f32 %v305_v25, %v311_v36 }
 0x229   : > { %v313_v38 = vmul.f32 1.442695, %v312_v37 }
 0x22b   : > { %831 = vpow2.f32 %v313_v38 }
 0x231   : > { %v832_v39 = vpop.eup %831 }
 0x232   : > { %v315_v40 = vsel %vm289_vm1, %v832_v39, 0.0  ;;  %v318_v41 = vpack.c.bf16 %v832_v39, %v832_v39  ;;  %v828_v39 = vld [vmem:[%s1243_s3] ss:$0 sm:$0xff] }
 0x233   : > { %316 = vadd.xlane.f32.xlu1 %v315_v40 }
 0x234   : > { %731 = vmatmul.msk.bf16.vlgmr.msra.gmra.mxu2 %vm289_vm1, %v318_v41 }
 0x239   : > { %v380_v42 = vpop.permute.xlu0 %379 }
 0x23a   : > { %v385_v44 = vsel %vm324_vm2, %v380_v42, 0 }
 0x23b   : > { %466 = vmax.xlane.f32.xlu1 %v465_v43  ;;  %394 = vmatpush.bf16.msrb.mxu2 %v385_v44 }
 0x241   : > { %v476_v45 = vpop.permute.xlu0 %475 }
 0x242   : > { %v481_v46 = vsel %vm324_vm2, %v476_v45, 0 }
 0x243   : > { %490 = vmatpush.bf16.msra.mxu2 %v481_v46 }
 0x244   : > { %733 = vmatmul.msk.bf16.vlgmr.msrb.gmra.mxu2 %vm289_vm1, %v378_v47 }
 0x247   : > { %591 = vmatpush.bf16.msrb.mxu2 %v582_v29 }
 0x293   : > { %v377_v60 = vpop.xlane.xlu0 %376 }
 0x2a6   : > { %v317_v48 = vpop.xlane.xlu1 %316 }
 0x2a7   : > { %833 = vrcp.f32 %v317_v48 }
 0x2ad   : > { %v834_v54 = vpop.eup %833 }
 0x2ae   : > { %v467_v51 = vpop.xlane.xlu1 %466 }
 0x2af   : > { %v468_v52 = vsub.f32 %v461_v27, %v467_v51 }
 0x2b1   : > { %v469_v53 = vmul.f32 1.442695, %v468_v52 }
 0x2b3   : > { %835 = vpow2.f32 %v469_v53 }
 0x2b4   : > { %837 = vrcp.f32 %v377_v60 }
 0x2b7   : > { %v337_v55 = vpop.f32.mrf.mxu2 }
 0x2b8   : > { %v342_v56 = vmul.f32 %v834_v54, %v337_v55 }
 0x2b9   : > { %v836_v57 = vpop.eup %835 }
 0x2ba   : > { %v474_v58 = vpack.c.bf16 %v836_v57, %v836_v57  ;;  %v343_v59 = vpack.c.bf16 %v342_v56, %v342_v56  ;;  %v838_v62 = vpop.eup %837  ;;  %v471_v14 = vsel %vm289_vm1, %v836_v57, 0.0 }
 0x2bc   : > { %735 = vmatmul.msk.bf16.vlgmr.msrb.gmra.mxu1 %vm289_vm1, %v343_v59  ;;  %737 = vmatmul.msk.bf16.vlgmr.msra.gmra.mxu2 %vm289_vm1, %v474_v58 }
 0x2bf   : > { %v339_v61 = vpop.f32.mrf.mxu2 }
 0x2c7   : > { %v396_v63 = vpop.f32.mrf.mxu2 }
 0x2c8   : > { %v401_v0 = vmul.f32 %v838_v62, %v396_v63 }
 0x2ca   : > { %v402_v1 = vpack.c.bf16 %v401_v0, %v401_v0 }
 0x2cc   : > { %734 = vmatmul.msk.bf16.vlgmr.msrb.gmra.mxu0 %vm289_vm1, %v402_v1  ;;  %739 = vmatmul.msk.bf16.vlgmr.msra.gmra.mxu1 %vm289_vm1, %v521_v30 }
 0x2cf   : > { %v398_v2 = vpop.f32.mrf.mxu2 }
 0x339   : > { %v438_v3 = vpop.f32.mrf.mxu1 }
 0x33f   : > { %v492_v5 = vpop.f32.mrf.mxu2 }
 0x341   : > { %v440_v6 = vpop.f32.mrf.mxu1 }
 0x347   : > { %v494_v7 = vpop.f32.mrf.mxu2 }
 0x349   : > { %v419_v8 = vpop.f32.mrf.mxu0  ;;  %v539_v9 = vpop.f32.mrf.mxu1 }
 0x34a   : > { %v439_v10 = vadd.f32 %v438_v3, %v419_v8  ;;  %v543_v11 = vsel %vm289_vm1, %v539_v9, -inf }
 0x34b   : > { %544 = vmax.xlane.f32.xlu1 %v543_v11 }
 0x351   : > { %v421_v12 = vpop.f32.mrf.mxu0  ;;  %v541_v13 = vpop.f32.mrf.mxu1 }
 0x364   : > { %553 = vrot.lane.b32.xlu1 %v1160_v4, %s1021_s24  ;;  %v504_v4 = vsel %vm324_vm2, %v499_v23, 0 }
 0x365   : > { %513 = vmatpush.bf16.msra.mxu0 %v504_v4 }
 0x38e   : > { %472 = vadd.xlane.f32.xlu1 %v471_v14 }
 0x3be   : > { %v545_v15 = vpop.xlane.xlu1 %544 }
 0x3bf   : > { %v546_v16 = vsub.f32 %v539_v9, %v545_v15 }
 0x3c1   : > { %v547_v17 = vmul.f32 1.442695, %v546_v16 }
 0x3c3   : > { %839 = vpow2.f32 %v547_v17 }
 0x3c9   : > { %v840_v18 = vpop.eup %839 }
 0x3ca   : > { %v549_v19 = vsel %vm289_vm1, %v840_v18, 0.0  ;;  %v552_v22 = vpack.c.bf16 %v840_v18, %v840_v18 }
 0x3cb   : > { %550 = vadd.xlane.f32.xlu2 %v549_v19 }
 0x3d6   : > { %v554_v20 = vpop.permute.xlu1 %553 }
 0x3d7   : > { %v559_v21 = vsel %vm324_vm2, %v554_v20, 0 }
 0x3d8   : > { %568 = vmatpush.bf16.msra.mxu3 %v559_v21 }
 0x3db   : > { %740 = vmatmul.msk.bf16.vlgmr.msra.gmra.mxu3 %vm289_vm1, %v552_v22 }
 0x401   : > { %v473_v24 = vpop.xlane.xlu1 %472 }
 0x402   : > { %841 = vrcp.f32 %v473_v24 }
 0x408   : > { %v842_v25 = vpop.eup %841 }
 0x409   : > { %v497_v26 = vmul.f32 %v842_v25, %v492_v5 }
 0x40b   : > { %v498_v27 = vpack.c.bf16 %v497_v26, %v497_v26 }
 0x40d   : > { %738 = vmatmul.msk.bf16.vlgmr.msra.gmra.mxu0 %vm289_vm1, %v498_v27 }
 0x43e   : > { %v551_v30 = vpop.xlane.xlu2 %550 }
 0x43f   : > { %843 = vrcp.f32 %v551_v30 }
 0x445   : > { %v844_v31 = vpop.eup %843 }
 0x45e   : > { %v570_v32 = vpop.f32.mrf.mxu3 }
 0x45f   : > { %v575_v33 = vmul.f32 %v844_v31, %v570_v32 }
 0x461   : > { %v576_v34 = vpack.c.bf16 %v575_v33, %v575_v33 }
 0x463   : > { %741 = vmatmul.msk.bf16.vlgmr.msrb.gmra.mxu2 %vm289_vm1, %v576_v34 }
 0x466   : > { %v572_v35 = vpop.f32.mrf.mxu3 }
 0x48a   : > { %v515_v36 = vpop.f32.mrf.mxu0 }
 0x48b   : > { %v519_v37 = vadd.f32 %v515_v36, %v439_v10 }
 0x492   : > { %v517_v38 = vpop.f32.mrf.mxu0 }
 0x4e6   : > { %v593_v40 = vpop.f32.mrf.mxu2 }
 0x4e7   : > { %v597_v41 = vadd.f32 %v593_v40, %v519_v37 }
 0x4e9   : > { %v602_v42 = vadd.f32 %v828_v39, %v597_v41 }
 0x4eb   : > { %603 = vst.msk [vmem:[%s247_s29] sm:$0xff] %vm266_vm0, %v602_v42 }
 0x4ec   : > { %962 = shalt.err (!%p959_p9)
}
 0x4ed   : > { %758 = dma.vmem_to_hbm [thread:$0]  (%p1116_p4), %s618_s30, 128, %s620_s5, %s605_s22  }
 0x4ee   : > { %v595_v43 = vpop.f32.mrf.mxu2 }
 0x4ef PF: > { %s631_s14 = sand.u32 1, %s993_s15   ;;  %p1251_p10 = scmp.ge.s32.totalorder %s1005_s18, 2 }
 0x4f0   : > { %s632_s12 = scalar_lea.sflag [#allocation4], %s631_s14 }
 0x4f1   : > { %p772_p13 = pnand %p1251_p10, %p1120_p6 }
 0x4f3   : > { %p773_p11 = pneg %p772_p13 }
 0x4f5   : > { %988 = dma.done.wait (%p773_p11), %s632_s12, 128  }
 0x4f6   : > { %990 = vsyncadd (%p773_p11), %s632_s12, 4294967168  ;;  %p18_p0 = scmp.ge.s32.totalorder %s1090_s8, 4   ;;  %s1252_s15 = smov %s997_s16 }
 0x4f7   : > { %s1253_s16 = smov %s1001_s17  ;;  %s1254_s17 = smov %s1101_s11 }
 0x4f8   : > { %s1255_s18 = smov %s1090_s8  ;;  %20 = sbr.rel (!%p18_p0) target bundleno = 6 (0x6), region = 89 }
 0x4fd   :  { %638 = vsyncpa [#allocation3], 1 }
 0x4fe   :  { %640 = vsyncpa [#allocation3 + $0x1], 1 }
 0x4ff   :  { %641 = vsyncpa [#allocation6], 1 }
 0x500   :  { %642 = vsyncpa [#allocation4], 1 }
 0x501   :  { %644 = vsyncpa [#allocation4 + $0x1], 1 }

</bundles_post_ra>
